<compile_context>
chip_gen: v6e
topology: v6e:2x2x1
jax: 0.10.0
libtpu: 0.0.40
codegen_flags: <defaults>
</compile_context>

<pallas_src>
import functools

import jax
import jax.numpy as jnp
from jax.experimental import pallas as pl
from jax.experimental.pallas import tpu as pltpu


# ------------------------------ helpers ------------------------------------- #

_LANE = 128        # vreg lane width
_SUBLANE = 8       # f32 sublane count
_TILE_TARGET = 256  # batch-tile cap: bounds live DAG intermediates to ~4x(256,Hp) f32


def _round_up(x, m):
    return ((x + m - 1) // m) * m


def _pad_axis(a, target, axis):
    pad = target - a.shape[axis]
    if pad <= 0:
        return a
    widths = [(0, 0)] * a.ndim
    widths[axis] = (0, pad)
    return jnp.pad(a, widths)


def _choose_tiling(batch):
    """Pick (padded_batch, tile_b).

    Guarantees >= 2 grid steps (so the "parallel" batch axis can shard across
    v7x's two TensorCores) and caps the tile at _TILE_TARGET rows so the
    unrolled DAG's live f32 intermediates do not spill the vreg file.  The
    padded batch is rounded up to a multiple of the tile (no degenerate small
    tiles for awkward batch sizes).
    """
    bp0 = max(_round_up(batch, _SUBLANE), _SUBLANE)
    if bp0 <= _TILE_TARGET:
        tile_b = max(_round_up((bp0 + 1) // 2, _SUBLANE), _SUBLANE)
        bp = 2 * tile_b
    else:
        tile_b = _TILE_TARGET
        bp = _round_up(bp0, tile_b)
    return bp, tile_b


def _validate_topology(n_nodes, edges):
    """Mirror of the trace-time unroll: every node that feeds an edge must
    already have an input when it is evaluated (same requirement as the
    original PyTorch Model.forward, which would otherwise hit `None * w`)."""
    connections = {i: [] for i in range(n_nodes)}
    for (i, j) in edges:
        assert 0 <= i < n_nodes, f"edge source {i} out of range"
        assert 0 <= j <= n_nodes, f"edge dest {j} out of range"
        connections[i].append(j)
    filled = [False] * (n_nodes + 1)
    filled[0] = True
    for i in range(n_nodes):
        if connections[i]:
            assert filled[i], f"node {i} feeds edges but has no input yet"
        for j in connections[i]:
            filled[j] = True
    assert filled[-1], "output buffer (slot n_nodes) is never written"


# ----------------------------- fused DAG kernel ------------------------------ #

def _make_fused_dag_kernel(n_nodes, edges):
    """Builds a kernel that unrolls the static DAG topology at trace time."""
    connections = {i: [] for i in range(n_nodes)}
    for idx, (i, j) in enumerate(edges):
        connections[i].append((j, idx))

    def kernel(ew_ref, x_ref, w_ref, b_ref, o_ref):
        # ew_ref : SMEM (n_edges,) f32          -- scalar-prefetched edge weights
        # x_ref  : VMEM (tile_b, Hp)  f32
        # w_ref  : VMEM (n_nodes, Hp, Hp) bf16  -- (in_features, out_features)
        # b_ref  : VMEM (n_nodes, 1, Hp) f32
        # o_ref  : VMEM (tile_b, Hp)  f32       -- buffer[-1]
        buf = [None] * (n_nodes + 1)
        buf[0] = x_ref[...]
        for i in range(n_nodes):
            y = None
            if buf[i] is not None:
                # Node i: y = relu(x @ W_i + b_i).
                # bf16 MXU inputs, f32 accumulation; bias/ReLU stay f32 (VPU).
                y = jnp.dot(buf[i].astype(jnp.bfloat16), w_ref[i],
                            preferred_element_type=jnp.float32)
                y = jnp.maximum(y + b_ref[i], 0.0)
            for j, eidx in connections[i]:
                # Weighted-edge accumulation in f32; first write initializes the
                # slot (no zero-seed), fan-out edges reuse the live value y.
                contrib = ew_ref[eidx] * y
                buf[j] = contrib if buf[j] is None else buf[j] + contrib
        o_ref[...] = buf[-1].astype(o_ref.dtype)

    return kernel


# ------------------------- parameter preparation ----------------------------- #

def prepare_params(w_stack, b_stack):
    """Pad to lane-dense shapes and cast weights to bf16 ONCE at init.

    Hoisted out of the per-call path so the per-call graph contains no
    HBM->HBM parameter copies.
    """
    _, H, _ = w_stack.shape
    Hp = max(_round_up(H, _LANE), _LANE)
    w_p = _pad_axis(_pad_axis(w_stack, Hp, 1), Hp, 2).astype(jnp.bfloat16)
    b_p = _pad_axis(b_stack, Hp, 2).astype(jnp.float32)
    return w_p, b_p


# ------------------------------ forward pass --------------------------------- #

@functools.partial(jax.jit, static_argnames=("edges",))
def fused_dag_forward(x, w_p, b_p, edge_w, *, edges):
    """One pallas_call for the whole DAG.

    x      : (B, H) f32
    w_p    : (n_nodes, Hp, Hp) bf16   (pre-padded, from prepare_params)
    b_p    : (n_nodes, 1, Hp)  f32    (pre-padded)
    edge_w : (n_edges,) f32
    """
    B, H = x.shape
    n_nodes, Hp, _ = w_p.shape
    _validate_topology(n_nodes, edges)

    # Residency ceiling of the "all weights as one resident 3-D block" design:
    # bf16, single-buffered -> n_nodes*Hp*Hp*2 bytes of scoped VMEM.  A K/N-tiled
    # variant (extra grid axis + f32 accumulator scratch) would be needed for
    # larger H; not required at this model size.
    assert n_nodes * Hp * Hp * 2 <= (48 << 20), \
        "H too large for the fused resident-weight design; use a K/N-tiled variant"

    Bp, tile_b = _choose_tiling(B)
    grid = (Bp // tile_b,)

    # Only the activation pad stays in the per-call path (x varies per call).
    x_p = _pad_axis(_pad_axis(x, Bp, 0), Hp, 1)

    # Scoped-VMEM budget: single-buffered bf16 weights + f32 biases, in/out
    # activation tiles double-buffered, live DAG intermediates, plus slack.
    act_tile = tile_b * Hp * 4
    needed = (w_p.size * 2 + b_p.size * 4
              + 4 * act_tile          # in + out tiles, double-buffered
              + 6 * act_tile          # live DAG values / spill headroom
              + (4 << 20))
    vmem_limit = int(min(max(needed, 32 << 20), 64 << 20))

    kernel = _make_fused_dag_kernel(n_nodes, edges)

    out = pl.pallas_call(
        kernel,
        out_shape=jax.ShapeDtypeStruct((Bp, Hp), jnp.float32),
        grid_spec=pltpu.PrefetchScalarGridSpec(
            num_scalar_prefetch=1,            # edge weights -> SMEM
            grid=grid,
            in_specs=[
                # activations: tiled over batch
                pl.BlockSpec((tile_b, Hp), lambda i, ew: (i, 0)),
                # weights/biases: constant index_map -> resident, single-buffered
                pl.BlockSpec((n_nodes, Hp, Hp), lambda i, ew: (0, 0, 0),
                             pipeline_mode=pl.Buffered(1)),
                pl.BlockSpec((n_nodes, 1, Hp), lambda i, ew: (0, 0, 0),
                             pipeline_mode=pl.Buffered(1)),
            ],
            out_specs=pl.BlockSpec((tile_b, Hp), lambda i, ew: (i, 0)),
        ),
        compiler_params=pltpu.CompilerParams(
            dimension_semantics=("parallel",),   # >=2 grid steps -> v7x 2-TC shard
            vmem_limit_bytes=vmem_limit,
        ),
    )(edge_w, x_p, w_p, b_p)

    # NOTE: padded batch rows contain relu(bias) garbage; the slice removes
    # them.  For large-batch production use, keep the padded (Bp, Hp) buffer
    # and drop this slice (it is an extra XLA copy per call).
    return out[:B, :H]


# --------------------------- pure-JAX references ------------------------------ #

def model_forward_ref_bf16(x, w_p, b_p, edge_w, edges, H):
    """Reference that mimics the kernel's bf16-matmul / f32-accumulate math."""
    n_nodes, Hp, _ = w_p.shape
    connections = {i: [] for i in range(n_nodes)}
    for idx, (i, j) in enumerate(edges):
        connections[i].append((j, idx))
    buf = [None] * (n_nodes + 1)
    buf[0] = _pad_axis(x, Hp, 1)
    for i in range(n_nodes):
        y = None
        if buf[i] is not None:
            y = jnp.dot(buf[i].astype(jnp.bfloat16), w_p[i],
                        preferred_element_type=jnp.float32)
            y = jnp.maximum(y + b_p[i], 0.0)
        for j, eidx in connections[i]:
            contrib = edge_w[eidx] * y
            buf[j] = contrib if buf[j] is None else buf[j] + contrib
    return buf[-1][:, :H]


def model_forward_ref_f32(x, w_stack, b_stack, edge_w, edges):
    """Exact f32 semantics of the original PyTorch Model.forward."""
    n_nodes = w_stack.shape[0]
    connections = {i: [] for i in range(n_nodes)}
    for idx, (i, j) in enumerate(edges):
        connections[i].append((j, idx))
    buf = [None] * (n_nodes + 1)
    buf[0] = x
    for i in range(n_nodes):
        y = None
        if buf[i] is not None:
            y = jnp.maximum(buf[i] @ w_stack[i] + b_stack[i], 0.0)
        for j, eidx in connections[i]:
            contrib = y * edge_w[eidx]
            buf[j] = contrib if buf[j] is None else buf[j] + contrib
    return buf[-1]


# ------------------------------ param init ----------------------------------- #

def init_params(key, n_nodes, hidden):
    # PyTorch Linear default init: U(-1/sqrt(fan_in), 1/sqrt(fan_in)).
    bound = 1.0 / (hidden ** 0.5)
    keys = jax.random.split(key, 2 * n_nodes)
    w_stack = jnp.stack([
        jax.random.uniform(keys[2 * i], (hidden, hidden), jnp.float32,
                           -bound, bound)
        for i in range(n_nodes)
    ])
    b_stack = jnp.stack([
        jax.random.uniform(keys[2 * i + 1], (1, hidden), jnp.float32,
                           -bound, bound)
        for i in range(n_nodes)
    ])
    return w_stack, b_stack


# --------------------------------- main -------------------------------------- #

if __name__ == "__main__":
    key = jax.random.PRNGKey(0)
    B, H = 8, 32
    N_NODES = 3
    edges = ((0, 1), (0, 2), (1, 2), (1, 3), (2, 3))

    kx, kp, ke = jax.random.split(key, 3)
    x = jax.random.normal(kx, (B, H), jnp.float32)
    w_stack, b_stack = init_params(kp, N_NODES, H)

    # Hoisted out of the per-call path: pad + bf16-cast parameters once.
    w_p, b_p = prepare_params(w_stack, b_stack)

    # Module init: every edge weight is torch.ones(1) -> 1.0
    edge_w_ones = jnp.ones((len(edges),), jnp.float32)
    out = jax.block_until_ready(
        fused_dag_forward(x, w_p, b_p, edge_w_ones, edges=edges))
    assert out.shape == (B, H)

    # Tight check vs bf16-matmul reference (same arithmetic as the kernel).
    ref = model_forward_ref_bf16(x, w_p, b_p, edge_w_ones, edges, H)
    assert jnp.allclose(out, ref, atol=1e-3, rtol=1e-3), \
        "mismatch vs bf16 JAX reference (unit edge weights)"

    # Loose sanity check vs exact-f32 PyTorch semantics (bf16 rounding noise).
    ref_f32 = model_forward_ref_f32(x, w_stack, b_stack, edge_w_ones, edges)
    assert jnp.allclose(out, ref_f32, atol=5e-2, rtol=5e-2), \
        "mismatch vs f32 JAX reference (unit edge weights)"

    # Exercise the weighted-edge path with non-unit edge weights.
    edge_w_rand = jax.random.uniform(ke, (len(edges),), jnp.float32, 0.5, 1.5)
    out2 = jax.block_until_ready(
        fused_dag_forward(x, w_p, b_p, edge_w_rand, edges=edges))
    ref2 = model_forward_ref_bf16(x, w_p, b_p, edge_w_rand, edges, H)
    assert jnp.allclose(out2, ref2, atol=1e-3, rtol=1e-3), \
        "mismatch vs bf16 JAX reference (random edge weights)"

    print("KERNEL_OK")
</pallas_src>

<mosaic_0001>
module attributes {stable_mosaic.version = 11 : i64} {
  func.func @kernel(%arg0: i32, %arg1: memref<5xf32, #tpu.memory_space<smem>>, %arg2: memref<8x128xf32, #tpu.memory_space<vmem>>, %arg3: memref<3x128x128xbf16, #tpu.memory_space<vmem>>, %arg4: memref<3x1x128xf32, #tpu.memory_space<vmem>>, %arg5: memref<8x128xf32, #tpu.memory_space<vmem>>) attributes {dimension_semantics = [#tpu.dimension_semantics<parallel>], iteration_bounds = array<i64: 2>, scalar_prefetch = 1 : i64, scratch_operands = 0 : i64, tpu.core_type = #tpu.core_type<tc>, window_params = [{transform_indices = @transform_0, window_bounds = array<i64: 8, 128>}, {pipeline_mode = #tpu.pipeline_mode<synchronous>, transform_indices = @transform_1, window_bounds = array<i64: 3, 128, 128>}, {pipeline_mode = #tpu.pipeline_mode<synchronous>, transform_indices = @transform_2, window_bounds = array<i64: 3, 1, 128>}, {transform_indices = @transform_3, window_bounds = array<i64: 8, 128>}]} {
    %c0 = arith.constant 0 : index
    %c0_0 = arith.constant 0 : index
    %0 = vector.load %arg2[%c0, %c0_0] : memref<8x128xf32, #tpu.memory_space<vmem>>, vector<8x128xf32>
    %1 = arith.truncf %0 : vector<8x128xf32> to vector<8x128xbf16>
    %c0_1 = arith.constant 0 : index
    %c0_2 = arith.constant 0 : index
    %c0_3 = arith.constant 0 : index
    %2 = vector.load %arg3[%c0_1, %c0_2, %c0_3] : memref<3x128x128xbf16, #tpu.memory_space<vmem>>, vector<1x128x128xbf16>
    %3 = vector.shape_cast %2 : vector<1x128x128xbf16> to vector<128x128xbf16>
    %cst = arith.constant dense<0.000000e+00> : vector<8x128xf32>
    %4 = tpu.matmul %1, %3, %cst {dimension_numbers = #tpu.dot_dimension_numbers<[1], [0], [0], [1], [0, 0, 1, 1], [], []>} : vector<8x128xbf16>, vector<128x128xbf16>, vector<8x128xf32> -> vector<8x128xf32>
    %c0_4 = arith.constant 0 : index
    %c0_5 = arith.constant 0 : index
    %c0_6 = arith.constant 0 : index
    %5 = vector.load %arg4[%c0_4, %c0_5, %c0_6] : memref<3x1x128xf32, #tpu.memory_space<vmem>>, vector<1x1x128xf32>
    %6 = vector.shape_cast %5 : vector<1x1x128xf32> to vector<1x128xf32>
    %7 = vector.broadcast %6 : vector<1x128xf32> to vector<8x128xf32>
    %8 = arith.addf %4, %7 : vector<8x128xf32>
    %cst_7 = arith.constant 0.000000e+00 : f32
    %9 = vector.broadcast %cst_7 : f32 to vector<8x128xf32>
    %10 = arith.maximumf %8, %9 : vector<8x128xf32>
    %c0_8 = arith.constant 0 : index
    %11 = memref.load %arg1[%c0_8] : memref<5xf32, #tpu.memory_space<smem>>
    %12 = vector.broadcast %11 : f32 to vector<8x128xf32>
    %13 = arith.mulf %12, %10 : vector<8x128xf32>
    %c1 = arith.constant 1 : index
    %14 = memref.load %arg1[%c1] : memref<5xf32, #tpu.memory_space<smem>>
    %15 = vector.broadcast %14 : f32 to vector<8x128xf32>
    %16 = arith.mulf %15, %10 : vector<8x128xf32>
    %17 = arith.truncf %13 : vector<8x128xf32> to vector<8x128xbf16>
    %c1_9 = arith.constant 1 : index
    %c0_10 = arith.constant 0 : index
    %c0_11 = arith.constant 0 : index
    %18 = vector.load %arg3[%c1_9, %c0_10, %c0_11] : memref<3x128x128xbf16, #tpu.memory_space<vmem>>, vector<1x128x128xbf16>
    %19 = vector.shape_cast %18 : vector<1x128x128xbf16> to vector<128x128xbf16>
    %cst_12 = arith.constant dense<0.000000e+00> : vector<8x128xf32>
    %20 = tpu.matmul %17, %19, %cst_12 {dimension_numbers = #tpu.dot_dimension_numbers<[1], [0], [0], [1], [0, 0, 1, 1], [], []>} : vector<8x128xbf16>, vector<128x128xbf16>, vector<8x128xf32> -> vector<8x128xf32>
    %c1_13 = arith.constant 1 : index
    %c0_14 = arith.constant 0 : index
    %c0_15 = arith.constant 0 : index
    %21 = vector.load %arg4[%c1_13, %c0_14, %c0_15] : memref<3x1x128xf32, #tpu.memory_space<vmem>>, vector<1x1x128xf32>
    %22 = vector.shape_cast %21 : vector<1x1x128xf32> to vector<1x128xf32>
    %23 = vector.broadcast %22 : vector<1x128xf32> to vector<8x128xf32>
    %24 = arith.addf %20, %23 : vector<8x128xf32>
    %cst_16 = arith.constant 0.000000e+00 : f32
    %25 = vector.broadcast %cst_16 : f32 to vector<8x128xf32>
    %26 = arith.maximumf %24, %25 : vector<8x128xf32>
    %c2 = arith.constant 2 : index
    %27 = memref.load %arg1[%c2] : memref<5xf32, #tpu.memory_space<smem>>
    %28 = vector.broadcast %27 : f32 to vector<8x128xf32>
    %29 = arith.mulf %28, %26 : vector<8x128xf32>
    %30 = arith.addf %16, %29 : vector<8x128xf32>
    %c3 = arith.constant 3 : index
    %31 = memref.load %arg1[%c3] : memref<5xf32, #tpu.memory_space<smem>>
    %32 = vector.broadcast %31 : f32 to vector<8x128xf32>
    %33 = arith.mulf %32, %26 : vector<8x128xf32>
    %34 = arith.truncf %30 : vector<8x128xf32> to vector<8x128xbf16>
    %c2_17 = arith.constant 2 : index
    %c0_18 = arith.constant 0 : index
    %c0_19 = arith.constant 0 : index
    %35 = vector.load %arg3[%c2_17, %c0_18, %c0_19] : memref<3x128x128xbf16, #tpu.memory_space<vmem>>, vector<1x128x128xbf16>
    %36 = vector.shape_cast %35 : vector<1x128x128xbf16> to vector<128x128xbf16>
    %cst_20 = arith.constant dense<0.000000e+00> : vector<8x128xf32>
    %37 = tpu.matmul %34, %36, %cst_20 {dimension_numbers = #tpu.dot_dimension_numbers<[1], [0], [0], [1], [0, 0, 1, 1], [], []>} : vector<8x128xbf16>, vector<128x128xbf16>, vector<8x128xf32> -> vector<8x128xf32>
    %c2_21 = arith.constant 2 : index
    %c0_22 = arith.constant 0 : index
    %c0_23 = arith.constant 0 : index
    %38 = vector.load %arg4[%c2_21, %c0_22, %c0_23] : memref<3x1x128xf32, #tpu.memory_space<vmem>>, vector<1x1x128xf32>
    %39 = vector.shape_cast %38 : vector<1x1x128xf32> to vector<1x128xf32>
    %40 = vector.broadcast %39 : vector<1x128xf32> to vector<8x128xf32>
    %41 = arith.addf %37, %40 : vector<8x128xf32>
    %cst_24 = arith.constant 0.000000e+00 : f32
    %42 = vector.broadcast %cst_24 : f32 to vector<8x128xf32>
    %43 = arith.maximumf %41, %42 : vector<8x128xf32>
    %c4 = arith.constant 4 : index
    %44 = memref.load %arg1[%c4] : memref<5xf32, #tpu.memory_space<smem>>
    %45 = vector.broadcast %44 : f32 to vector<8x128xf32>
    %46 = arith.mulf %45, %43 : vector<8x128xf32>
    %47 = arith.addf %33, %46 : vector<8x128xf32>
    %c0_25 = arith.constant 0 : index
    %c0_26 = arith.constant 0 : index
    %48 = vector.load %arg5[%c0_25, %c0_26] : memref<8x128xf32, #tpu.memory_space<vmem>>, vector<8x128xf32>
    tpu.vector_store %arg5[%c0_25, %c0_26], %47 {strides = array<i32>} : memref<8x128xf32, #tpu.memory_space<vmem>>, vector<8x128xf32>,
    return
  }
  func.func @transform_0(%arg0: i32, %arg1: memref<5xf32, #tpu.memory_space<smem>>) -> (i32, i32) {
    %c0_i32 = arith.constant 0 : i32
    %c0_i32_0 = arith.constant 0 : i32
    return %arg0, %c0_i32 : i32, i32
  }
  func.func @transform_1(%arg0: i32, %arg1: memref<5xf32, #tpu.memory_space<smem>>) -> (i32, i32, i32) {
    %c0_i32 = arith.constant 0 : i32
    %c0_i32_0 = arith.constant 0 : i32
    %c0_i32_1 = arith.constant 0 : i32
    %c0_i32_2 = arith.constant 0 : i32
    return %c0_i32, %c0_i32_0, %c0_i32_1 : i32, i32, i32
  }
  func.func @transform_2(%arg0: i32, %arg1: memref<5xf32, #tpu.memory_space<smem>>) -> (i32, i32, i32) {
    %c0_i32 = arith.constant 0 : i32
    %c0_i32_0 = arith.constant 0 : i32
    %c0_i32_1 = arith.constant 0 : i32
    %c0_i32_2 = arith.constant 0 : i32
    return %c0_i32, %c0_i32_0, %c0_i32_1 : i32, i32, i32
  }
  func.func @transform_3(%arg0: i32, %arg1: memref<5xf32, #tpu.memory_space<smem>>) -> (i32, i32) {
    %c0_i32 = arith.constant 0 : i32
    %c0_i32_0 = arith.constant 0 : i32
    return %arg0, %c0_i32 : i32, i32
  }
}

</mosaic_0001>

<bundles_post_ra>
// kernel: fused_dag_forward.1
= control target key start
LH: loop header
LB: loop body
LE: loop exit
PB: predicated region body
PF: predicated region fallthrough
CT: control target
= control target key end

     0   :  { %s966_s0 = inlined_call_operand.vmem [shape: f32[5], index: 0, kind: input, shape index: {}]   ;;  %s967_s1 = inlined_call_operand.vmem [shape: f32[16,128], index: 1, kind: input, shape index: {}]   ;;  %s968_s2 = inlined_call_operand.hbm [shape: bf16[3,128,128], index: 2, kind: input, shape index: {}]   ;;  %s969_s3 = inlined_call_operand.vmem [shape: f32[3,1,128], index: 3, kind: input, shape index: {}]   ;;  %s970_s4 = inlined_call_operand.vmem [shape: f32[16,128], index: 4, kind: output, shape index: {}]  }
   0x1   :  { %s9_s17 = sshll.u32 %s966_s0, 4  ;;  %s10_s17 = int_to_ptr.vmem [resolvable:$true] %s9_s17 }
   0x2   :  { %s795_s18 = scalar_lea.vmem %s10_s17, 16  ;;  %p800_p1 = scmp.lt.s32.totalorder %s10_s17, %s10_s17 }
   0x3   :  { %p796_p0 = scmp.ne.s32.totalorder %s10_s17, %s795_s18  ;;  %p801_p2 = scmp.lt.s32.totalorder %s795_s18, %s795_s18 }
   0x5   :  { %p802_p3 = por %p801_p2, %p800_p1 }
   0x7   :  { %p803_p4 = pnand %p802_p3, %p796_p0 }
   0x9   :  { %806 = shalt.err (!%p803_p4)  }
   0xa   :  { %s847_s19 = smov [#allocation3]  }
   0xb   :  { %12 = dma.vmem_to_smem %s10_s17, 16, %s847_s19, [#allocation2] }
   0xc   :  { %837 = dma.done.wait [#allocation2], 16 }
   0xd   :  { %838 = vsyncadd [#allocation2], 4294967280 }
   0xe   :  { %14 = sfence }
   0xf   :  { %15 = vsyncpa [#allocation5], 0  ;;  %s881_s20 = smov 0  }
  0x10 LB: > { %s887_s0 = sadd.s32 4294967295, %s845_s20   ;;  %p618_p5 = scmp.ge.s32.totalorder %s845_s20, 1  ;;  %s845_s20 = sphi %s881_s20, %s21_s20  }
  0x11   : > { %p120_p6 = scmp.lt.s32.totalorder %s845_s20, 3  ;;  %s848_s21 = smov [#allocation4]  }
  0x12   : > { %s132_s22 = sshll.u32 %s848_s21, 4  ;;  %p755_p8 = scmp.eq.s32.totalorder %s887_s0, 0  ;;  %s133_s22 = int_to_ptr.vmem [resolvable:$true] %s132_s22 }
  0x13   : > { %p891_p7 = pnand %p618_p5, %p120_p6  ;;  %s818_s24 = scalar_lea.vmem %s133_s22, 3072 }
  0x14   : > { %p819_p12 = scmp.ne.s32.totalorder %s133_s22, %s818_s24  ;;  %p826_p1 = scmp.lt.s32.totalorder %s133_s22, %s133_s22 }
  0x15   : > { %p751_p9 = pneg %p891_p7  ;;  %p827_p2 = scmp.lt.s32.totalorder %s818_s24, %s818_s24 }
  0x17   : > { %p752_p10 = pnand %p755_p8, %p751_p9  ;;  %p828_p3 = por %p827_p2, %p826_p1 }
  0x19   : > { %p809_p11 = pneg %p752_p10 }
  0x1b   : > { %p821_p13 = pnand %p819_p12, %p809_p11 }
  0x1d   : > { %p822_p0 = pneg %p821_p13 }
  0x1f   : > { %p829_p4 = pnand %p828_p3, %p822_p0 }
  0x21   : > { %832 = shalt.err (!%p829_p4)
}
  0x22   : > { %s849_s25 = smov 64   ;;  %s850_s26 = smov 4  }
  0x23   : > { %754 = dma.hbm_to_vmem [thread:$0]  (!%p752_p10), %s968_s2, 3072, %s133_s22, [#allocation5], %s849_s25, %s849_s25, %s850_s26  }
  0x24   : > { %158 = sbr.rel (%p891_p7) target bundleno = 682 (0x2aa), region = 32 }
  0x29   : > { %840 = dma.done.wait (%p755_p8), [#allocation5], 3072  }
  0x2a   : > { %842 = vsyncadd (%p755_p8), [#allocation5], 4294964224  ;;  %v851_v0 = vmov 0.0   ;;  %vm852_vm0 = vmmov 0   ;;  %v771_v1 = vld [vmem:[#allocation4 + $0x38] sm:$0xff]   ;;  %v772_v2 = vld [vmem:[#allocation4 + $0x30] sm:$0xff]  }
  0x2b   : > { %687 = vmatprep.subr.bf16.mxu0 %v851_v0  ;;  %703 = vmatprep.mubr.msk.bf16.mxu0 %vm852_vm0, %v851_v0  ;;  %v773_v3 = vld [vmem:[#allocation4 + $0x28] sm:$0xff]   ;;  %p180_p5 = scmp.lt.s32.totalorder %s887_s0, 1  ;;  %v779_v4 = vld [vmem:[#allocation4 + $0x78] sm:$0xff]   ;;  %v774_v5 = vld [vmem:[#allocation4 + $0x20] sm:$0xff]   ;;  %s303_s7 = sld [smem:[#allocation3]] }
  0x2c   : > { %707 = vmatprep.subr.bf16.mxu1 %v851_v0  ;;  %723 = vmatprep.mubr.msk.bf16.mxu1 %vm852_vm0, %v851_v0  ;;  %v780_v6 = vld [vmem:[#allocation4 + $0x70] sm:$0xff]   ;;  %v775_v7 = vld [vmem:[#allocation4 + $0x18] sm:$0xff]   ;;  %v781_v8 = vld [vmem:[#allocation4 + $0x68] sm:$0xff]   ;;  %s634_s10 = sld [smem:[#allocation3 + $0x1]] }
  0x2d   : > { %688 = vmatpush3.bf16.msra.mxu0 %v771_v1  ;;  %s973_s0 = smov (!%p180_p5, %s887_s0), 1  ;;  %708 = vmatpush3.bf16.msra.mxu1 %v779_v4  ;;  %v776_v9 = vld [vmem:[#allocation4 + $0x10] sm:$0xff]   ;;  %v782_v10 = vld [vmem:[#allocation4 + $0x60] sm:$0xff]   ;;  %v777_v11 = vld [vmem:[#allocation4 + $0x8] sm:$0xff]   ;;  %s645_s11 = sld [smem:[#allocation3 + $0x2]] }
  0x2e   : > { %689 = vmatprep.subr.bf16.mxu0 %v851_v0  ;;  %709 = vmatprep.subr.bf16.mxu1 %v851_v0  ;;  %s623_s29 = sshll.u32 %s973_s0, 3  ;;  %v783_v12 = vld [vmem:[#allocation4 + $0x58] sm:$0xff]   ;;  %v778_v13 = vld [vmem:[#allocation4] sm:$0xff]   ;;  %v784_v15 = vld [vmem:[#allocation4 + $0x50] sm:$0xff]   ;;  %s646_s14 = sld [smem:[#allocation3 + $0x3]] }
  0x2f   : > { %s183_s6 = scalar_lea.vmem %s967_s1, %s623_s29  ;;  %v785_v17 = vld [vmem:[#allocation4 + $0x48] sm:$0xff]   ;;  %v786_v18 = vld [vmem:[#allocation4 + $0x40] sm:$0xff]   ;;  %v787_v19 = vld [vmem:[#allocation4 + $0xb8] sm:$0xff]   ;;  %s657_s15 = sld [smem:[#allocation3 + $0x4]] }
  0x30   : > { %v189_v14 = vld [vmem:[%s183_s6] sm:$0xff]  ;;  %v788_v20 = vld [vmem:[#allocation4 + $0xb0] sm:$0xff]   ;;  %v789_v21 = vld [vmem:[#allocation4 + $0xa8] sm:$0xff]   ;;  %s187_s21 = scalar_lea.vmem %s970_s4, %s623_s29 }
  0x31   : > { %690 = vmatpush3.bf16.msra.mxu0 %v772_v2  ;;  %710 = vmatpush3.bf16.msra.mxu1 %v780_v6  ;;  %v190_v16 = vpack.c.bf16 %v189_v14, %v189_v14  ;;  %v790_v22 = vld [vmem:[#allocation4 + $0xa0] sm:$0xff]   ;;  %v791_v23 = vld [vmem:[#allocation4 + $0x98] sm:$0xff]   ;;  %v304_v27 = vstv %s303_s7  ;;  %v792_v34 = vld [vmem:[#allocation4 + $0x90] sm:$0xff]  }
  0x32   : > { %691 = vmatprep.subr.bf16.mxu0 %v851_v0  ;;  %711 = vmatprep.subr.bf16.mxu1 %v851_v0  ;;  %v625_v24 = vld [vmem:[%s969_s3] ss:$0 sm:$0xff]  ;;  %v793_v35 = vld [vmem:[#allocation4 + $0x88] sm:$0xff]   ;;  %v636_v37 = vld [vmem:[%s969_s3 + $0x1] ss:$0 sm:$0xff]  ;;  %v307_v40 = vstv %s634_s10 }
  0x33   : > { %v794_v36 = vld [vmem:[#allocation4 + $0x80] sm:$0xff]   ;;  %v425_v41 = vstv %s645_s11 }
  0x34   : > { %v648_v50 = vld [vmem:[%s969_s3 + $0x2] ss:$0 sm:$0xff]  ;;  %v429_v53 = vstv %s646_s14 }
  0x35   : > { %692 = vmatpush3.bf16.msra.mxu0 %v773_v3  ;;  %712 = vmatpush3.bf16.msra.mxu1 %v781_v8  ;;  %v547_v54 = vstv %s657_s15 }
  0x36   : > { %693 = vmatprep.subr.bf16.mxu0 %v851_v0  ;;  %713 = vmatprep.subr.bf16.mxu1 %v851_v0 }
  0x39   : > { %694 = vmatpush3.bf16.msra.mxu0 %v774_v5  ;;  %714 = vmatpush3.bf16.msra.mxu1 %v782_v10 }
  0x3a   : > { %695 = vmatprep.subr.bf16.mxu0 %v851_v0  ;;  %715 = vmatprep.subr.bf16.mxu1 %v851_v0 }
  0x3d   : > { %696 = vmatpush3.bf16.msra.mxu0 %v775_v7  ;;  %716 = vmatpush3.bf16.msra.mxu1 %v783_v12 }
  0x3e   : > { %697 = vmatprep.subr.bf16.mxu0 %v851_v0  ;;  %717 = vmatprep.subr.bf16.mxu1 %v851_v0 }
  0x41   : > { %698 = vmatpush3.bf16.msra.mxu0 %v776_v9  ;;  %718 = vmatpush3.bf16.msra.mxu1 %v784_v15 }
  0x42   : > { %699 = vmatprep.subr.bf16.mxu0 %v851_v0  ;;  %719 = vmatprep.subr.bf16.mxu1 %v851_v0 }
  0x45   : > { %700 = vmatpush3.bf16.msra.mxu0 %v777_v11  ;;  %720 = vmatpush3.bf16.msra.mxu1 %v785_v17 }
  0x46   : > { %701 = vmatprep.subr.bf16.mxu0 %v851_v0  ;;  %721 = vmatprep.subr.bf16.mxu1 %v851_v0 }
  0x49   : > { %702 = vmatpush3.bf16.msra.mxu0 %v778_v13  ;;  %722 = vmatpush3.bf16.msra.mxu1 %v786_v18 }
  0x4a   : > { %727 = vmatprep.subr.bf16.mxu0 %v851_v0 }
  0x4c   : > { %704 = vmatmul.mubr.bf16.vlgmr.msra.gmra.mxu0 %v190_v16 }
  0x4d   : > { %743 = vmatprep.mubr.msk.bf16.mxu0 %vm852_vm0, %v851_v0  ;;  %728 = vmatpush3.bf16.msra.mxu0 %v787_v19 }
  0x4e   : > { %729 = vmatprep.subr.bf16.mxu0 %v851_v0 }
  0x51   : > { %730 = vmatpush3.bf16.msra.mxu0 %v788_v20 }
  0x52   : > { %731 = vmatprep.subr.bf16.mxu0 %v851_v0 }
  0x55   : > { %732 = vmatpush3.bf16.msra.mxu0 %v789_v21 }
  0x56   : > { %733 = vmatprep.subr.bf16.mxu0 %v851_v0 }
  0x59   : > { %734 = vmatpush3.bf16.msra.mxu0 %v790_v22 }
  0x5a   : > { %735 = vmatprep.subr.bf16.mxu0 %v851_v0 }
  0x5d   : > { %736 = vmatpush3.bf16.msra.mxu0 %v791_v23 }
  0x5e   : > { %737 = vmatprep.subr.bf16.mxu0 %v851_v0 }
  0x61   : > { %738 = vmatpush3.bf16.msra.mxu0 %v792_v34 }
  0x62   : > { %739 = vmatprep.subr.bf16.mxu0 %v851_v0 }
  0x65   : > { %740 = vmatpush3.bf16.msra.mxu0 %v793_v35 }
  0x66   : > { %741 = vmatprep.subr.bf16.mxu0 %v851_v0 }
  0x69   : > { %742 = vmatpush3.bf16.msra.mxu0 %v794_v36 }
 0x10c   : > { %v296_v25 = vpop.f32.mrf.mxu0 }
 0x10d   : > { %v297_v26 = vadd.f32 %v625_v24, %v296_v25 }
 0x10e   : > { %v705_v28 = vpop.f32.mrf.mxu0 }
 0x10f   : > { %v302_v29 = vmax.f32 %v297_v26, 0.0 }
 0x110   : > { %v299_v30 = vpop.f32.mrf.mxu0 }
 0x111   : > { %v305_v31 = vmul.f32 %v304_v27, %v302_v29  ;;  %v308_v45 = vmul.f32 %v307_v40, %v302_v29 }
 0x112   : > { %v706_v32 = vpop.f32.mrf.mxu0 }
 0x113   : > { %v309_v33 = vpack.c.bf16 %v305_v31, %v305_v31 }
 0x115   : > { %724 = vmatmul.mubr.bf16.vlgmr.msra.gmra.mxu1 %v309_v33 }
 0x1d5   : > { %v417_v38 = vpop.f32.mrf.mxu1 }
 0x1d6   : > { %v418_v39 = vadd.f32 %v636_v37, %v417_v38 }
 0x1d7   : > { %v725_v42 = vpop.f32.mrf.mxu1 }
 0x1d8   : > { %v423_v43 = vmax.f32 %v418_v39, 0.0 }
 0x1d9   : > { %v420_v44 = vpop.f32.mrf.mxu1 }
 0x1da   : > { %v426_v46 = vmul.f32 %v425_v41, %v423_v43  ;;  %v430_v58 = vmul.f32 %v429_v53, %v423_v43 }
 0x1db   : > { %v726_v47 = vpop.f32.mrf.mxu1 }
 0x1dc   : > { %v427_v48 = vadd.f32 %v426_v46, %v308_v45 }
 0x1de   : > { %v431_v49 = vpack.c.bf16 %v427_v48, %v427_v48 }
 0x1e0   : > { %744 = vmatmul.mubr.bf16.vlgmr.msra.gmra.mxu0 %v431_v49 }
 0x2a0   : > { %v539_v51 = vpop.f32.mrf.mxu0 }
 0x2a1   : > { %v540_v52 = vadd.f32 %v648_v50, %v539_v51 }
 0x2a2   : > { %v745_v55 = vpop.f32.mrf.mxu0 }
 0x2a3   : > { %v545_v56 = vmax.f32 %v540_v52, 0.0 }
 0x2a4   : > { %v542_v57 = vpop.f32.mrf.mxu0 }
 0x2a5   : > { %v548_v59 = vmul.f32 %v547_v54, %v545_v56 }
 0x2a6   : > { %v746_v60 = vpop.f32.mrf.mxu0 }
 0x2a7   : > { %v549_v61 = vadd.f32 %v548_v59, %v430_v58 }
 0x2a9   : > { %550 = vst [vmem:[%s187_s21] sm:$0xff] %v549_v61 }
 0x2aa PF: > { %s21_s20 = sadd.s32 1, %s845_s20  }
 0x2ab   : > { %p18_p6 = scmp.ge.s32.totalorder %s21_s20, 4  }
 0x2ad   :  { %20 = sbr.rel (!%p18_p6) target bundleno = 16 (0x10), region = 71 }
 0x2b2   :  { %570 = vsyncpa [#allocation5], 1 }
 0x2b3   :  { %572 = vsyncpa [#allocation5 + $0x1], 1 }

</bundles_post_ra>
